<compile_context>
chip_gen: v7x
topology: tpu7x:2x2x1
jax: 0.10.0
libtpu: 0.0.40
codegen_flags: <defaults>
</compile_context>

<pallas_src>
import jax
import jax.numpy as jnp
from jax.experimental import pallas as pl
from jax.experimental.pallas import tpu as pltpu

HIDDEN = 128
LANE = 128


def _round_up(n, m):
    return ((n + m - 1) // m) * m


def mlp_prod_kernel(x_ref,
                    w1_ref, b1_ref,
                    w2_ref, b2_ref,
                    w3_ref, b3_ref,
                    w4_ref, b4_ref,
                    ypred_ref, unc_ref):
    # ---- 4 Linear layers: bf16 MXU inputs, f32 accumulation ----------------
    # x arrives already in bf16 (cast in the wrapper).
    h = x_ref[...]
    h = jnp.dot(h, w1_ref[...], preferred_element_type=jnp.float32) + b1_ref[...]
    # ReLU after the bf16 cast: identical result to max-then-cast (cast is
    # monotone, preserves 0) but halves VPU traffic / live f32 temporaries on
    # chips with a bf16 VALU (v6e/v7x); on v5e the compiler widens as needed.
    h = jnp.maximum(h.astype(jnp.bfloat16), 0.0)
    h = jnp.dot(h, w2_ref[...], preferred_element_type=jnp.float32) + b2_ref[...]
    h = jnp.maximum(h.astype(jnp.bfloat16), 0.0)
    h = jnp.dot(h, w3_ref[...], preferred_element_type=jnp.float32) + b3_ref[...]
    h = jnp.maximum(h.astype(jnp.bfloat16), 0.0)
    logits = jnp.dot(h, w4_ref[...], preferred_element_type=jnp.float32) + b4_ref[...]

    # ---- softmax epilogue without materializing probs ----------------------
    # argmax(softmax(logits)) == argmax(logits);
    # max(softmax(logits))    == 1 / sum(exp(logits - max(logits))).
    m = jnp.max(logits, axis=1, keepdims=True)                   # (TB, 1)  XLU
    s = jnp.sum(jnp.exp(logits - m), axis=1, keepdims=True)      # (TB, 1)  EUP+XLU
    pmax = pl.reciprocal(s, approx=False)                        # exact, EUP slot

    n_cls = logits.shape[1]
    ids = jax.lax.broadcasted_iota(jnp.int32, logits.shape, 1)
    # first-occurrence argmax (matches torch.argmax); padded classes sit at
    # ~-1e30 and can never reach the max.
    first_idx = jnp.min(jnp.where(logits >= m, ids, n_cls), axis=1, keepdims=True)

    # Lane-dense (1, TB) stores (batch on the lane axis).
    ypred_ref[...] = first_idx.astype(jnp.int32).T
    unc_ref[...] = (1.0 - pmax).T


def mlp_prod_forward(x, params, *, block_b=4096):
    """x: (B, in_features) float32 -> (y_pred (B,) int32, uncertainty (B,) f32)."""
    w1, b1, w2, b2, w3, b3, w4, b4 = params
    B, in_features = x.shape
    out_features = w4.shape[1]

    # --- pad the last layer to a lane-dense width (128-multiple) ------------
    out_pad = _round_up(out_features, LANE)
    pad_cols = out_pad - out_features
    if pad_cols:
        # Padded w4 columns are ZERO and b4 stays f32 with -1e30, so padded
        # logits are ~-1e30: never win the max, exp underflows to 0.
        # NOTE: do not cast this padded b4 to bf16 (-1e30 would overflow to -inf)
        # and do not reuse this scheme with non-zero padded weight columns.
        w4 = jnp.pad(w4, ((0, 0), (0, pad_cols)))
        b4 = jnp.pad(b4, ((0, 0), (0, pad_cols)), constant_values=-1e30)

    # --- weights in bf16 (MXU inputs); biases stay f32 (added post-acc) -----
    w1b, w2b, w3b, w4b = (w.astype(jnp.bfloat16) for w in (w1, w2, w3, w4))

    # --- batch tiling --------------------------------------------------------
    block_b = max(_round_up(block_b, LANE), LANE)        # always 128-aligned
    tb = min(block_b, _round_up(B, 8))
    # v7x megacore: when the batch is big enough to split, cap the tile so the
    # grid has >=2 "parallel" steps and both TensorCores get work.
    if B > 2 * LANE:
        tb = min(tb, _round_up((B + 1) // 2, LANE))
    b_pad = _round_up(B, tb)
    if b_pad > tb:
        # multi-step grid: lane width of the (1, tb) output tiles must be
        # 128-aligned; guaranteed by the rounding above.
        assert tb % LANE == 0
    x_p = jnp.pad(x, ((0, b_pad - B), (0, 0))) if b_pad != B else x
    # Cast x in the wrapper: halves x DMA bytes + double-buffered VMEM; the
    # kernel computes in bf16 anyway, so this is numerically identical.
    x_p = x_p.astype(jnp.bfloat16)
    grid = (b_pad // tb,)

    def _full(shape):
        return pl.BlockSpec(shape, lambda i: (0, 0))     # VMEM-resident, DMA'd once

    in_specs = [
        pl.BlockSpec((tb, in_features), lambda i: (i, 0)),   # x tile
        _full(w1b.shape), _full(b1.shape),
        _full(w2b.shape), _full(b2.shape),
        _full(w3b.shape), _full(b3.shape),
        _full(w4b.shape), _full(b4.shape),
    ]
    out_specs = (
        pl.BlockSpec((1, tb), lambda i: (0, i)),             # y_pred slab
        pl.BlockSpec((1, tb), lambda i: (0, i)),             # uncertainty slab
    )
    out_shape = (
        jax.ShapeDtypeStruct((1, b_pad), jnp.int32),
        jax.ShapeDtypeStruct((1, b_pad), jnp.float32),
    )

    weight_bytes = sum(int(a.size) * a.dtype.itemsize
                       for a in (w1b, b1, w2b, b2, w3b, b3, w4b, b4))

    # VMEM budget: ~12 live (tb,128) f32 temporaries + double-buffered bf16 x
    # tile + weights, clamped to [32 MiB, 64 MiB]: above v5e's 16 MiB scoped
    # default, never above v7x's 64 MiB physical VMEM per TensorCore.
    vmem_need = (12 * tb * HIDDEN * 4
                 + 2 * tb * in_features * 2
                 + 2 * weight_bytes
                 + (1 << 20))
    vmem_limit = int(min(max(vmem_need, 32 << 20), 64 << 20))

    cost = pl.CostEstimate(
        flops=2 * b_pad * (in_features * HIDDEN + 2 * HIDDEN * HIDDEN + HIDDEN * out_pad),
        transcendentals=b_pad * (out_pad + 1),
        bytes_accessed=int(x_p.size) * 2 + weight_bytes + b_pad * 8,
    )

    y_pred, unc = pl.pallas_call(
        mlp_prod_kernel,
        out_shape=out_shape,
        grid=grid,
        in_specs=in_specs,
        out_specs=out_specs,
        compiler_params=pltpu.CompilerParams(
            dimension_semantics=("parallel",),
            vmem_limit_bytes=vmem_limit,
        ),
        cost_estimate=cost,
    )(x_p, w1b, b1, w2b, b2, w3b, b3, w4b, b4)

    return y_pred[0, :B], unc[0, :B]


def init_params(key, in_features, out_features):
    """Deterministic synthetic parameters (shapes match MLPProd.__init__)."""
    dims = [(in_features, HIDDEN), (HIDDEN, HIDDEN), (HIDDEN, HIDDEN), (HIDDEN, out_features)]
    params = []
    for i, (din, dout) in enumerate(dims):
        kw, kb = jax.random.split(jax.random.fold_in(key, i))
        scale = 1.0 / jnp.sqrt(jnp.float32(din))
        w = jax.random.uniform(kw, (din, dout), jnp.float32, -scale, scale)
        b = jax.random.uniform(kb, (1, dout), jnp.float32, -scale, scale)
        params.extend([w, b])
    return tuple(params)


def reference_forward(x, params):
    """Pure-JAX reference mirroring the kernel's bf16-in / f32-accumulate math."""
    w1, b1, w2, b2, w3, b3, w4, b4 = params

    def dot(a, w):
        return jnp.dot(a.astype(jnp.bfloat16), w.astype(jnp.bfloat16),
                       preferred_element_type=jnp.float32)

    h = jnp.maximum(dot(x, w1) + b1, 0.0)
    h = jnp.maximum(dot(h, w2) + b2, 0.0)
    h = jnp.maximum(dot(h, w3) + b3, 0.0)
    logits = dot(h, w4) + b4
    probs = jax.nn.softmax(logits, axis=1)
    return jnp.argmax(probs, axis=1).astype(jnp.int32), 1.0 - jnp.max(probs, axis=1)


if __name__ == "__main__":
    IN_FEATURES, OUT_FEATURES = 32, 4

    key = jax.random.PRNGKey(0)
    kp, kx1, kx2, kx3 = jax.random.split(key, 4)
    params = init_params(kp, IN_FEATURES, OUT_FEATURES)

    # Case 1: tiny batch -> single grid step (block equals full array).
    x_small = jax.random.normal(kx1, (16, IN_FEATURES), jnp.float32)
    y1, u1 = mlp_prod_forward(x_small, params)

    # Case 2: batch larger than the tile -> multi-step pipelined grid + padding.
    x_big = jax.random.normal(kx2, (300, IN_FEATURES), jnp.float32)
    y2, u2 = mlp_prod_forward(x_big, params, block_b=128)

    # Case 3: default tile with B > 2*128 -> exercises the megacore tile cap
    # (tb = 384, grid of 2 balanced steps) and batch padding.
    x_mid = jax.random.normal(kx3, (600, IN_FEATURES), jnp.float32)
    y3, u3 = mlp_prod_forward(x_mid, params)

    jax.block_until_ready((y1, u1, y2, u2, y3, u3))

    for x, y, u in ((x_small, y1, u1), (x_big, y2, u2), (x_mid, y3, u3)):
        y_ref, unc_ref = reference_forward(x, params)
        assert y.shape == y_ref.shape and u.shape == unc_ref.shape
        assert jnp.all(y == y_ref), "argmax mismatch vs reference"
        assert jnp.allclose(u, unc_ref, atol=5e-3), "uncertainty mismatch vs reference"

    print("KERNEL_OK")
</pallas_src>

<mosaic_0001>
module attributes {stable_mosaic.version = 11 : i64} {
  func.func @mlp_prod_kernel(%arg0: i32, %arg1: memref<16x32xbf16, #tpu.memory_space<vmem>>, %arg2: memref<32x128xbf16, #tpu.memory_space<vmem>>, %arg3: memref<1x128xf32, #tpu.memory_space<vmem>>, %arg4: memref<128x128xbf16, #tpu.memory_space<vmem>>, %arg5: memref<1x128xf32, #tpu.memory_space<vmem>>, %arg6: memref<128x128xbf16, #tpu.memory_space<vmem>>, %arg7: memref<1x128xf32, #tpu.memory_space<vmem>>, %arg8: memref<128x128xbf16, #tpu.memory_space<vmem>>, %arg9: memref<1x128xf32, #tpu.memory_space<vmem>>, %arg10: memref<1x16xi32, #tpu.memory_space<vmem>>, %arg11: memref<1x16xf32, #tpu.memory_space<vmem>>) attributes {dimension_semantics = [#tpu.dimension_semantics<parallel>], iteration_bounds = array<i64: 1>, scalar_prefetch = 0 : i64, scratch_operands = 0 : i64, tpu.core_type = #tpu.core_type<tc>, window_params = [{transform_indices = @transform_0, window_bounds = array<i64: 16, 32>}, {pipeline_mode = #tpu.pipeline_mode<synchronous>, transform_indices = @transform_1, window_bounds = array<i64: 32, 128>}, {pipeline_mode = #tpu.pipeline_mode<synchronous>, transform_indices = @transform_2, window_bounds = array<i64: 1, 128>}, {pipeline_mode = #tpu.pipeline_mode<synchronous>, transform_indices = @transform_3, window_bounds = array<i64: 128, 128>}, {pipeline_mode = #tpu.pipeline_mode<synchronous>, transform_indices = @transform_4, window_bounds = array<i64: 1, 128>}, {pipeline_mode = #tpu.pipeline_mode<synchronous>, transform_indices = @transform_5, window_bounds = array<i64: 128, 128>}, {pipeline_mode = #tpu.pipeline_mode<synchronous>, transform_indices = @transform_6, window_bounds = array<i64: 1, 128>}, {pipeline_mode = #tpu.pipeline_mode<synchronous>, transform_indices = @transform_7, window_bounds = array<i64: 128, 128>}, {pipeline_mode = #tpu.pipeline_mode<synchronous>, transform_indices = @transform_8, window_bounds = array<i64: 1, 128>}, {transform_indices = @transform_9, window_bounds = array<i64: 1, 16>}, {transform_indices = @transform_10, window_bounds = array<i64: 1, 16>}]} {
    %c0 = arith.constant 0 : index
    %c0_0 = arith.constant 0 : index
    %0 = vector.load %arg1[%c0, %c0_0] : memref<16x32xbf16, #tpu.memory_space<vmem>>, vector<16x32xbf16>
    %c0_1 = arith.constant 0 : index
    %c0_2 = arith.constant 0 : index
    %1 = vector.load %arg2[%c0_1, %c0_2] : memref<32x128xbf16, #tpu.memory_space<vmem>>, vector<32x128xbf16>
    %cst = arith.constant dense<0.000000e+00> : vector<16x128xf32>
    %2 = tpu.matmul %0, %1, %cst {dimension_numbers = #tpu.dot_dimension_numbers<[1], [0], [0], [1], [0, 0, 1, 1], [], []>} : vector<16x32xbf16>, vector<32x128xbf16>, vector<16x128xf32> -> vector<16x128xf32>
    %c0_3 = arith.constant 0 : index
    %c0_4 = arith.constant 0 : index
    %3 = vector.load %arg3[%c0_3, %c0_4] : memref<1x128xf32, #tpu.memory_space<vmem>>, vector<1x128xf32>
    %4 = vector.broadcast %3 : vector<1x128xf32> to vector<16x128xf32>
    %5 = arith.addf %2, %4 : vector<16x128xf32>
    %6 = arith.truncf %5 : vector<16x128xf32> to vector<16x128xbf16>
    %cst_5 = arith.constant 0.000000e+00 : bf16
    %7 = vector.broadcast %cst_5 : bf16 to vector<16x128xbf16>
    %8 = arith.maximumf %6, %7 : vector<16x128xbf16>
    %c0_6 = arith.constant 0 : index
    %c0_7 = arith.constant 0 : index
    %9 = vector.load %arg4[%c0_6, %c0_7] : memref<128x128xbf16, #tpu.memory_space<vmem>>, vector<128x128xbf16>
    %cst_8 = arith.constant dense<0.000000e+00> : vector<16x128xf32>
    %10 = tpu.matmul %8, %9, %cst_8 {dimension_numbers = #tpu.dot_dimension_numbers<[1], [0], [0], [1], [0, 0, 1, 1], [], []>} : vector<16x128xbf16>, vector<128x128xbf16>, vector<16x128xf32> -> vector<16x128xf32>
    %c0_9 = arith.constant 0 : index
    %c0_10 = arith.constant 0 : index
    %11 = vector.load %arg5[%c0_9, %c0_10] : memref<1x128xf32, #tpu.memory_space<vmem>>, vector<1x128xf32>
    %12 = vector.broadcast %11 : vector<1x128xf32> to vector<16x128xf32>
    %13 = arith.addf %10, %12 : vector<16x128xf32>
    %14 = arith.truncf %13 : vector<16x128xf32> to vector<16x128xbf16>
    %cst_11 = arith.constant 0.000000e+00 : bf16
    %15 = vector.broadcast %cst_11 : bf16 to vector<16x128xbf16>
    %16 = arith.maximumf %14, %15 : vector<16x128xbf16>
    %c0_12 = arith.constant 0 : index
    %c0_13 = arith.constant 0 : index
    %17 = vector.load %arg6[%c0_12, %c0_13] : memref<128x128xbf16, #tpu.memory_space<vmem>>, vector<128x128xbf16>
    %cst_14 = arith.constant dense<0.000000e+00> : vector<16x128xf32>
    %18 = tpu.matmul %16, %17, %cst_14 {dimension_numbers = #tpu.dot_dimension_numbers<[1], [0], [0], [1], [0, 0, 1, 1], [], []>} : vector<16x128xbf16>, vector<128x128xbf16>, vector<16x128xf32> -> vector<16x128xf32>
    %c0_15 = arith.constant 0 : index
    %c0_16 = arith.constant 0 : index
    %19 = vector.load %arg7[%c0_15, %c0_16] : memref<1x128xf32, #tpu.memory_space<vmem>>, vector<1x128xf32>
    %20 = vector.broadcast %19 : vector<1x128xf32> to vector<16x128xf32>
    %21 = arith.addf %18, %20 : vector<16x128xf32>
    %22 = arith.truncf %21 : vector<16x128xf32> to vector<16x128xbf16>
    %cst_17 = arith.constant 0.000000e+00 : bf16
    %23 = vector.broadcast %cst_17 : bf16 to vector<16x128xbf16>
    %24 = arith.maximumf %22, %23 : vector<16x128xbf16>
    %c0_18 = arith.constant 0 : index
    %c0_19 = arith.constant 0 : index
    %25 = vector.load %arg8[%c0_18, %c0_19] : memref<128x128xbf16, #tpu.memory_space<vmem>>, vector<128x128xbf16>
    %cst_20 = arith.constant dense<0.000000e+00> : vector<16x128xf32>
    %26 = tpu.matmul %24, %25, %cst_20 {dimension_numbers = #tpu.dot_dimension_numbers<[1], [0], [0], [1], [0, 0, 1, 1], [], []>} : vector<16x128xbf16>, vector<128x128xbf16>, vector<16x128xf32> -> vector<16x128xf32>
    %c0_21 = arith.constant 0 : index
    %c0_22 = arith.constant 0 : index
    %27 = vector.load %arg9[%c0_21, %c0_22] : memref<1x128xf32, #tpu.memory_space<vmem>>, vector<1x128xf32>
    %28 = vector.broadcast %27 : vector<1x128xf32> to vector<16x128xf32>
    %29 = arith.addf %26, %28 : vector<16x128xf32>
    %cst_23 = arith.constant dense<0xFF800000> : vector<16xf32>
    %30 = vector.multi_reduction <maximumf>, %29, %cst_23 [1] : vector<16x128xf32> to vector<16xf32>
    %31 = vector.shape_cast %30 : vector<16xf32> to vector<16x1xf32>
    %32 = vector.broadcast %31 : vector<16x1xf32> to vector<16x128xf32>
    %33 = arith.subf %29, %32 : vector<16x128xf32>
    %34 = math.exp %33 : vector<16x128xf32>
    %cst_24 = arith.constant dense<0.000000e+00> : vector<16xf32>
    %35 = vector.multi_reduction <add>, %34, %cst_24 [1] : vector<16x128xf32> to vector<16xf32>
    %36 = vector.shape_cast %35 : vector<16xf32> to vector<16x1xf32>
    %37 = tpu.reciprocal %36 : vector<16x1xf32> -> vector<16x1xf32>
    %38 = tpu.iota {dimensions = array<i32: 1>} : vector<16x128xi32>
    %39 = vector.broadcast %31 : vector<16x1xf32> to vector<16x128xf32>
    %40 = arith.cmpf oge, %29, %39 : vector<16x128xf32>
    %c128_i32 = arith.constant 128 : i32
    %41 = vector.broadcast %c128_i32 : i32 to vector<16x128xi32>
    %42 = arith.select %40, %38, %41 : vector<16x128xi1>, vector<16x128xi32>
    %cst_25 = arith.constant dense<2147483647> : vector<16xi32>
    %43 = vector.multi_reduction <minsi>, %42, %cst_25 [1] : vector<16x128xi32> to vector<16xi32>
    %44 = vector.shape_cast %43 : vector<16xi32> to vector<16x1xi32>
    %45 = tpu.transpose %44, [1, 0] : vector<16x1xi32> -> vector<1x16xi32>
    %c0_26 = arith.constant 0 : index
    %c0_27 = arith.constant 0 : index
    %46 = vector.load %arg10[%c0_26, %c0_27] : memref<1x16xi32, #tpu.memory_space<vmem>>, vector<1x16xi32>
    tpu.vector_store %arg10[%c0_26, %c0_27], %45 {strides = array<i32>} : memref<1x16xi32, #tpu.memory_space<vmem>>, vector<1x16xi32>,
    %cst_28 = arith.constant 1.000000e+00 : f32
    %47 = vector.broadcast %cst_28 : f32 to vector<16x1xf32>
    %48 = arith.subf %47, %37 : vector<16x1xf32>
    %49 = tpu.transpose %48, [1, 0] : vector<16x1xf32> -> vector<1x16xf32>
    %c0_29 = arith.constant 0 : index
    %c0_30 = arith.constant 0 : index
    %50 = vector.load %arg11[%c0_29, %c0_30] : memref<1x16xf32, #tpu.memory_space<vmem>>, vector<1x16xf32>
    tpu.vector_store %arg11[%c0_29, %c0_30], %49 {strides = array<i32>} : memref<1x16xf32, #tpu.memory_space<vmem>>, vector<1x16xf32>,
    return
  }
  func.func @transform_0(%arg0: i32) -> (i32, i32) {
    %c0_i32 = arith.constant 0 : i32
    %c0_i32_0 = arith.constant 0 : i32
    return %arg0, %c0_i32 : i32, i32
  }
  func.func @transform_1(%arg0: i32) -> (i32, i32) {
    %c0_i32 = arith.constant 0 : i32
    %c0_i32_0 = arith.constant 0 : i32
    %c0_i32_1 = arith.constant 0 : i32
    return %c0_i32, %c0_i32_0 : i32, i32
  }
  func.func @transform_2(%arg0: i32) -> (i32, i32) {
    %c0_i32 = arith.constant 0 : i32
    %c0_i32_0 = arith.constant 0 : i32
    %c0_i32_1 = arith.constant 0 : i32
    return %c0_i32, %c0_i32_0 : i32, i32
  }
  func.func @transform_3(%arg0: i32) -> (i32, i32) {
    %c0_i32 = arith.constant 0 : i32
    %c0_i32_0 = arith.constant 0 : i32
    %c0_i32_1 = arith.constant 0 : i32
    return %c0_i32, %c0_i32_0 : i32, i32
  }
  func.func @transform_4(%arg0: i32) -> (i32, i32) {
    %c0_i32 = arith.constant 0 : i32
    %c0_i32_0 = arith.constant 0 : i32
    %c0_i32_1 = arith.constant 0 : i32
    return %c0_i32, %c0_i32_0 : i32, i32
  }
  func.func @transform_5(%arg0: i32) -> (i32, i32) {
    %c0_i32 = arith.constant 0 : i32
    %c0_i32_0 = arith.constant 0 : i32
    %c0_i32_1 = arith.constant 0 : i32
    return %c0_i32, %c0_i32_0 : i32, i32
  }
  func.func @transform_6(%arg0: i32) -> (i32, i32) {
    %c0_i32 = arith.constant 0 : i32
    %c0_i32_0 = arith.constant 0 : i32
    %c0_i32_1 = arith.constant 0 : i32
    return %c0_i32, %c0_i32_0 : i32, i32
  }
  func.func @transform_7(%arg0: i32) -> (i32, i32) {
    %c0_i32 = arith.constant 0 : i32
    %c0_i32_0 = arith.constant 0 : i32
    %c0_i32_1 = arith.constant 0 : i32
    return %c0_i32, %c0_i32_0 : i32, i32
  }
  func.func @transform_8(%arg0: i32) -> (i32, i32) {
    %c0_i32 = arith.constant 0 : i32
    %c0_i32_0 = arith.constant 0 : i32
    %c0_i32_1 = arith.constant 0 : i32
    return %c0_i32, %c0_i32_0 : i32, i32
  }
  func.func @transform_9(%arg0: i32) -> (i32, i32) {
    %c0_i32 = arith.constant 0 : i32
    %c0_i32_0 = arith.constant 0 : i32
    return %c0_i32, %arg0 : i32, i32
  }
  func.func @transform_10(%arg0: i32) -> (i32, i32) {
    %c0_i32 = arith.constant 0 : i32
    %c0_i32_0 = arith.constant 0 : i32
    return %c0_i32, %arg0 : i32, i32
  }
}

</mosaic_0001>

<bundles_post_ra>
// kernel: tpu_custom_call.1
= control target key start
LH: loop header
LB: loop body
LE: loop exit
PB: predicated region body
PF: predicated region fallthrough
CT: control target
= control target key end

     0   :  { %16 = vsyncpa [#allocation3], 0  ;;  %s1241_s0 = inlined_call_operand.hbm [shape: bf16[16,32], index: 0, kind: input, shape index: {}]   ;;  %s1242_s1 = inlined_call_operand.hbm [shape: bf16[32,128], index: 1, kind: input, shape index: {}]   ;;  %s1243_s2 = inlined_call_operand.vmem [shape: f32[1,128], index: 2, kind: input, shape index: {}]   ;;  %s1244_s3 = inlined_call_operand.hbm [shape: bf16[128,128], index: 3, kind: input, shape index: {}]   ;;  %s1245_s4 = inlined_call_operand.vmem [shape: f32[1,128], index: 4, kind: input, shape index: {}]   ;;  %s1246_s5 = inlined_call_operand.hbm [shape: bf16[128,128], index: 5, kind: input, shape index: {}]   ;;  %s1247_s6 = inlined_call_operand.vmem [shape: f32[1,128], index: 6, kind: input, shape index: {}]   ;;  %s1248_s7 = inlined_call_operand.hbm [shape: bf16[128,128], index: 7, kind: input, shape index: {}]   ;;  %s1249_s8 = inlined_call_operand.vmem [shape: f32[1,128], index: 8, kind: input, shape index: {}]   ;;  %s1250_s9 = inlined_call_operand.hbm [shape: s32[1,16], index: 9, kind: output, shape index: {0}]   ;;  %s1251_s10 = inlined_call_operand.hbm [shape: f32[1,16], index: 10, kind: output, shape index: {1}]  }
   0x1   :  { %17 = vsyncpa [#allocation6], 0 }
   0x2   :  { %18 = vsyncpa [#allocation9], 0 }
   0x3   :  { %19 = vsyncpa [#allocation4], 0 }
   0x4   :  { %20 = vsyncpa [#allocation13], 0  ;;  %s1013_s13 = smov [#allocation5]   ;;  %s1014_s15 = smov [#allocation8]  }
   0x5   :  { %s38_s14 = sshll.u32 %s1013_s13, 4  ;;  %s66_s16 = sshll.u32 %s1014_s15, 4  ;;  %s39_s14 = int_to_ptr.vmem [resolvable:$true] %s38_s14  ;;  %s1080_s16 = int_to_ptr.vmem [resolvable:$true] %s66_s16 }
   0x6   :  { %s849_s19 = scalar_lea.hbm %s1242_s1, 256 }
   0x7   :  { %p850_p0 = scmp.ne.s32.totalorder %s1242_s1, %s849_s19  ;;  %p853_p1 = scmp.lt.u32.totalorder %s849_s19, %s1242_s1 }
   0x9   :  { %p855_p2 = pnand %p853_p1, %p850_p0 }
   0xb   :  { %858 = shalt.err (!%p855_p2)
}
   0xc   :  { %s859_s24 = scalar_lea.vmem %s39_s14, 256  ;;  %p864_p4 = scmp.lt.s32.totalorder %s39_s14, %s39_s14 }
   0xd   :  { %p860_p3 = scmp.ne.s32.totalorder %s39_s14, %s859_s24  ;;  %p865_p5 = scmp.lt.s32.totalorder %s859_s24, %s859_s24 }
   0xf   :  { %p866_p6 = por %p865_p5, %p864_p4 }
  0x11   :  { %p867_p7 = pnand %p866_p6, %p860_p3 }
  0x13   :  { %870 = shalt.err (!%p867_p7)
}
  0x14   :  { %s1015_s25 = smov 64   ;;  %s1016_s26 = smov 4  }
  0x15   :  { %44 = dma.hbm_to_vmem [thread:$0]  %s1242_s1, 256, %s39_s14, [#allocation6], %s1015_s25, %s1015_s25, %s1016_s26  }
  0x16   :  { %s871_s11 = scalar_lea.hbm %s1246_s5, 1024 }
  0x17   :  { %p872_p8 = scmp.ne.s32.totalorder %s1246_s5, %s871_s11  ;;  %p875_p9 = scmp.lt.u32.totalorder %s871_s11, %s1246_s5 }
  0x19   :  { %p877_p10 = pnand %p875_p9, %p872_p8 }
  0x1b   :  { %880 = shalt.err (!%p877_p10)
}
  0x1c   :  { %s881_s18 = scalar_lea.vmem %s1080_s16, 1024  ;;  %p886_p12 = scmp.lt.s32.totalorder %s1080_s16, %s1080_s16 }
  0x1d   :  { %p882_p11 = scmp.ne.s32.totalorder %s1080_s16, %s881_s18  ;;  %p887_p13 = scmp.lt.s32.totalorder %s881_s18, %s881_s18 }
  0x1f   :  { %p888_p0 = por %p887_p13, %p886_p12 }
  0x21   :  { %p889_p1 = pnand %p888_p0, %p882_p11 }
  0x23   :  { %892 = shalt.err (!%p889_p1)
}
  0x24   :  { %72 = dma.hbm_to_vmem [thread:$0]  %s1246_s5, 1024, %s1080_s16, [#allocation9], %s1015_s25, %s1015_s25, %s1016_s26  }
  0x25   :  { %s1017_s19 = smov [#allocation2]   ;;  %s1018_s21 = smov [#allocation7]  }
  0x26   :  { %s26_s20 = sshll.u32 %s1017_s19, 4  ;;  %s52_s22 = sshll.u32 %s1018_s21, 4  ;;  %s27_s20 = int_to_ptr.vmem [resolvable:$true] %s26_s20  ;;  %s1117_s22 = int_to_ptr.vmem [resolvable:$true] %s52_s22 }
  0x27   :  { %s893_s27 = scalar_lea.hbm %s1241_s0, 128 }
  0x28   :  { %p894_p2 = scmp.ne.s32.totalorder %s1241_s0, %s893_s27  ;;  %p897_p3 = scmp.lt.u32.totalorder %s893_s27, %s1241_s0 }
  0x2a   :  { %p899_p4 = pnand %p897_p3, %p894_p2 }
  0x2c   :  { %902 = shalt.err (!%p899_p4)
}
  0x2d   :  { %s903_s5 = scalar_lea.vmem %s27_s20, 128  ;;  %p908_p6 = scmp.lt.s32.totalorder %s27_s20, %s27_s20 }
  0x2e   :  { %p904_p5 = scmp.ne.s32.totalorder %s27_s20, %s903_s5  ;;  %p909_p7 = scmp.lt.s32.totalorder %s903_s5, %s903_s5 }
  0x30   :  { %p910_p8 = por %p909_p7, %p908_p6 }
  0x32   :  { %p911_p9 = pnand %p910_p8, %p904_p5 }
  0x34   :  { %914 = shalt.err (!%p911_p9)
}
  0x35   :  { %32 = dma.hbm_to_vmem [thread:$0]  %s1241_s0, 128, %s27_s20, [#allocation3], %s1015_s25, %s1015_s25, %s1016_s26  }
  0x36   :  { %s915_s17 = scalar_lea.hbm %s1244_s3, 1024 }
  0x37   :  { %p916_p10 = scmp.ne.s32.totalorder %s1244_s3, %s915_s17  ;;  %p919_p11 = scmp.lt.u32.totalorder %s915_s17, %s1244_s3 }
  0x39   :  { %p921_p12 = pnand %p919_p11, %p916_p10 }
  0x3b   :  { %924 = shalt.err (!%p921_p12)
}
  0x3c   :  { %s925_s21 = scalar_lea.vmem %s1117_s22, 1024  ;;  %p930_p0 = scmp.lt.s32.totalorder %s1117_s22, %s1117_s22 }
  0x3d   :  { %p926_p13 = scmp.ne.s32.totalorder %s1117_s22, %s925_s21  ;;  %p931_p1 = scmp.lt.s32.totalorder %s925_s21, %s925_s21 }
  0x3f   :  { %p932_p2 = por %p931_p1, %p930_p0 }
  0x41   :  { %p933_p3 = pnand %p932_p2, %p926_p13 }
  0x43   :  { %936 = shalt.err (!%p933_p3)
}
  0x44   :  { %58 = dma.hbm_to_vmem [thread:$0]  %s1244_s3, 1024, %s1117_s22, [#allocation6], %s1015_s25, %s1015_s25, %s1016_s26  }
  0x45   :  { %s1019_s23 = smov [#allocation10]   ;;  %s937_s29 = scalar_lea.hbm %s1248_s7, 1024 }
  0x46   :  { %s80_s24 = sshll.u32 %s1019_s23, 4  ;;  %p938_p4 = scmp.ne.s32.totalorder %s1248_s7, %s937_s29  ;;  %s81_s24 = int_to_ptr.vmem [resolvable:$true] %s80_s24 }
  0x47   :  { %p941_p5 = scmp.lt.u32.totalorder %s937_s29, %s1248_s7 }
  0x49   :  { %p943_p6 = pnand %p941_p5, %p938_p4 }
  0x4b   :  { %946 = shalt.err (!%p943_p6)
}
  0x4c   :  { %s947_s12 = scalar_lea.vmem %s81_s24, 1024  ;;  %p952_p8 = scmp.lt.s32.totalorder %s81_s24, %s81_s24 }
  0x4d   :  { %p948_p7 = scmp.ne.s32.totalorder %s81_s24, %s947_s12  ;;  %p953_p9 = scmp.lt.s32.totalorder %s947_s12, %s947_s12 }
  0x4f   :  { %p954_p10 = por %p953_p9, %p952_p8 }
  0x51   :  { %p955_p11 = pnand %p954_p10, %p948_p7 }
  0x53   :  { %958 = shalt.err (!%p955_p11)
}
  0x54   :  { %86 = dma.hbm_to_vmem [thread:$0]  %s1248_s7, 1024, %s81_s24, [#allocation9], %s1015_s25, %s1015_s25, %s1016_s26  }
  0x55   :  { %1003 = dma.done.wait [#allocation3], 128  }
  0x56   :  { %1004 = vsyncadd [#allocation3], 4294967168 }
  0x57   :  { %1005 = dma.done.wait [#allocation6], 1280  }
  0x58   :  { %1006 = vsyncadd [#allocation6], 4294966016 }
  0x59   :  { %1007 = dma.done.wait [#allocation9], 2048  }
  0x5a   :  { %1008 = vsyncadd [#allocation9], 4294965248  ;;  %v1020_v0 = vmov 0.0   ;;  %vm1021_vm0 = vmmov 0   ;;  %v814_v1 = vld [vmem:[#allocation5] sm:$0xff]   ;;  %v815_v2 = vld [vmem:[#allocation5 + $0x8] sm:$0xff]   ;;  %v538_v63 = vlaneseq }
  0x5b   :  { %734 = vmatprep.subr.bf16.mxu0 %v1020_v0  ;;  %738 = vmatprep.mubr.msk.bf16.mxu0 %vm1021_vm0, %v1020_v0  ;;  %v817_v3 = vld [vmem:[#allocation7] sm:$0xff]   ;;  %v816_v4 = vld [vmem:[#allocation2] sm:$0xff]   ;;  %vm135_vm1 = vcmask 261120   ;;  %v819_v6 = vld [vmem:[#allocation7 + $0x10] sm:$0xff]   ;;  %v1022_v26 = vmov 0   ;;  %vm604_vm6 = vcmask 122880  }
  0x5c   :  { %742 = vmatprep.subr.bf16.mxu1 %v1020_v0  ;;  %758 = vmatprep.mubr.msk.bf16.mxu1 %vm1021_vm0, %v1020_v0  ;;  %v818_v5 = vld [vmem:[#allocation7 + $0x8] sm:$0xff]   ;;  %v820_v7 = vld [vmem:[#allocation7 + $0x18] sm:$0xff]   ;;  %v821_v8 = vld [vmem:[#allocation7 + $0x20] sm:$0xff]  }
  0x5d   :  { %735 = vmatpush3.bf16.msra.mxu0 %v814_v1  ;;  %743 = vmatpush3.bf16.msra.mxu1 %v817_v3  ;;  %v822_v9 = vld [vmem:[#allocation7 + $0x28] sm:$0xff]   ;;  %v823_v10 = vld [vmem:[#allocation7 + $0x30] sm:$0xff]   ;;  %v824_v11 = vld [vmem:[#allocation7 + $0x38] sm:$0xff]  }
  0x5e   :  { %736 = vmatprep.subr.bf16.mxu0 %v1020_v0  ;;  %744 = vmatprep.subr.bf16.mxu1 %v1020_v0  ;;  %v825_v12 = vld [vmem:[#allocation8] sm:$0xff]   ;;  %v826_v13 = vld [vmem:[#allocation8 + $0x8] sm:$0xff]   ;;  %v827_v14 = vld [vmem:[#allocation8 + $0x10] sm:$0xff]  }
  0x5f   :  { %v828_v15 = vld [vmem:[#allocation8 + $0x18] sm:$0xff]   ;;  %v829_v16 = vld [vmem:[#allocation8 + $0x20] sm:$0xff]   ;;  %v830_v17 = vld [vmem:[#allocation8 + $0x28] sm:$0xff]  }
  0x60   :  { %v672_v18 = vld [vmem:[%s1243_s2] ss:$0 sm:$0xff]  ;;  %v831_v28 = vld [vmem:[#allocation8 + $0x30] sm:$0xff]   ;;  %v832_v29 = vld [vmem:[#allocation8 + $0x38] sm:$0xff]  }
  0x61   :  { %737 = vmatpush3.bf16.msra.mxu0 %v815_v2  ;;  %745 = vmatpush3.bf16.msra.mxu1 %v818_v5  ;;  %v833_v30 = vld [vmem:[#allocation10] sm:$0xff]   ;;  %v834_v31 = vld [vmem:[#allocation10 + $0x8] sm:$0xff]   ;;  %v835_v32 = vld [vmem:[#allocation10 + $0x10] sm:$0xff]  }
  0x62   :  { %762 = vmatprep.subr.bf16.mxu0 %v1020_v0  ;;  %746 = vmatprep.subr.bf16.mxu1 %v1020_v0  ;;  %v836_v33 = vld [vmem:[#allocation10 + $0x18] sm:$0xff]   ;;  %v837_v34 = vld [vmem:[#allocation10 + $0x20] sm:$0xff]   ;;  %v838_v35 = vld [vmem:[#allocation10 + $0x28] sm:$0xff]  }
  0x63   :  { %v677_v36 = vld [vmem:[%s1245_s4] ss:$0 sm:$0xff]  ;;  %v839_v45 = vld [vmem:[#allocation10 + $0x30] sm:$0xff]   ;;  %v840_v46 = vld [vmem:[#allocation10 + $0x38] sm:$0xff]  }
  0x64   :  { %739 = vmatmul.mubr.msk.bf16.vlgmr.msra.gmra.mrb[0].mxu0 %vm135_vm1, %v816_v4  ;;  %v686_v47 = vld [vmem:[%s1247_s6] ss:$0 sm:$0xff]  ;;  %s1023_s6 = smov [#allocation12]  }
  0x65   :  { %778 = vmatprep.mubr.msk.bf16.mxu0 %vm1021_vm0, %v1020_v0  ;;  %747 = vmatpush3.bf16.msra.mxu1 %v819_v6  ;;  %v695_v56 = vld [vmem:[%s1249_s8] ss:$0 sm:$0xff]  ;;  %s657_s8 = sshll.u32 %s1023_s6, 4  ;;  %s658_s8 = int_to_ptr.vmem [resolvable:$true] %s657_s8 }
  0x66   :  { %748 = vmatprep.subr.bf16.mxu1 %v1020_v0  ;;  %763 = vmatpush3.bf16.msra.mxu0 %v825_v12  ;;  %s959_s18 = scalar_lea.vmem %s658_s8, 16  ;;  %s963_s1 = scalar_lea.vmem %s658_s8, 32 }
  0x67   :  { %764 = vmatprep.subr.bf16.mxu0 %v1020_v0  ;;  %p960_p12 = scmp.ne.s32.totalorder %s658_s8, %s959_s18  ;;  %p964_p13 = scmp.lt.s32.totalorder %s658_s8, %s658_s8 }
  0x68   :  { %p965_p0 = scmp.lt.s32.totalorder %s963_s1, %s959_s18 }
  0x69   :  { %749 = vmatpush3.bf16.msra.mxu1 %v820_v7 }
  0x6a   :  { %750 = vmatprep.subr.bf16.mxu1 %v1020_v0  ;;  %765 = vmatpush3.bf16.msra.mxu0 %v826_v13  ;;  %p966_p1 = por %p965_p0, %p964_p13 }
  0x6b   :  { %766 = vmatprep.subr.bf16.mxu0 %v1020_v0 }
  0x6c   :  { %p967_p2 = pnand %p966_p1, %p960_p12 }
  0x6d   :  { %751 = vmatpush3.bf16.msra.mxu1 %v821_v8 }
  0x6e   :  { %752 = vmatprep.subr.bf16.mxu1 %v1020_v0  ;;  %767 = vmatpush3.bf16.msra.mxu0 %v827_v14 }
  0x6f   :  { %768 = vmatprep.subr.bf16.mxu0 %v1020_v0 }
  0x71   :  { %753 = vmatpush3.bf16.msra.mxu1 %v822_v9 }
  0x72   :  { %754 = vmatprep.subr.bf16.mxu1 %v1020_v0  ;;  %769 = vmatpush3.bf16.msra.mxu0 %v828_v15 }
  0x73   :  { %770 = vmatprep.subr.bf16.mxu0 %v1020_v0 }
  0x75   :  { %755 = vmatpush3.bf16.msra.mxu1 %v823_v10 }
  0x76   :  { %756 = vmatprep.subr.bf16.mxu1 %v1020_v0  ;;  %771 = vmatpush3.bf16.msra.mxu0 %v829_v16 }
  0x77   :  { %772 = vmatprep.subr.bf16.mxu0 %v1020_v0 }
  0x79   :  { %757 = vmatpush3.bf16.msra.mxu1 %v824_v11 }
  0x7a   :  { %782 = vmatprep.subr.bf16.mxu1 %v1020_v0  ;;  %773 = vmatpush3.bf16.msra.mxu0 %v830_v17 }
  0x7b   :  { %774 = vmatprep.subr.bf16.mxu0 %v1020_v0 }
  0x7e   :  { %775 = vmatpush3.bf16.msra.mxu0 %v831_v28 }
  0x7f   :  { %776 = vmatprep.subr.bf16.mxu0 %v1020_v0 }
  0x82   :  { %777 = vmatpush3.bf16.msra.mxu0 %v832_v29 }
 0x137   :  { %v173_v19 = vpop.f32.mrb[0].mxu0 }
 0x138   :  { %v740_v20 = vpop.f32.mrb[1].mxu0  ;;  %v174_v22 = vadd.f32 %v672_v18, %v173_v19 }
 0x139   :  { %v176_v21 = vpop.f32.mrb[2].mxu0 }
 0x13a   :  { %v177_v23 = vadd.f32 %v672_v18, %v176_v21  ;;  %v741_v24 = vpop.f32.mrb[3].mxu0 }
 0x13c   :  { %v180_v25 = vpack.c.bf16 %v177_v23, %v174_v22 }
 0x13e   :  { %v181_v27 = vmax.bf16 %v1022_v26, %v180_v25 }
 0x140   :  { %759 = vmatmul.mubr.bf16.vlgmr.msra.gmra.mrb[0].mxu1 %v181_v27 }
 0x141   :  { %798 = vmatprep.mubr.msk.bf16.mxu1 %vm1021_vm0, %v1020_v0  ;;  %783 = vmatpush3.bf16.msra.mxu1 %v833_v30 }
 0x142   :  { %784 = vmatprep.subr.bf16.mxu1 %v1020_v0 }
 0x145   :  { %785 = vmatpush3.bf16.msra.mxu1 %v834_v31 }
 0x146   :  { %786 = vmatprep.subr.bf16.mxu1 %v1020_v0 }
 0x149   :  { %787 = vmatpush3.bf16.msra.mxu1 %v835_v32 }
 0x14a   :  { %788 = vmatprep.subr.bf16.mxu1 %v1020_v0 }
 0x14d   :  { %789 = vmatpush3.bf16.msra.mxu1 %v836_v33 }
 0x14e   :  { %790 = vmatprep.subr.bf16.mxu1 %v1020_v0 }
 0x151   :  { %791 = vmatpush3.bf16.msra.mxu1 %v837_v34 }
 0x152   :  { %792 = vmatprep.subr.bf16.mxu1 %v1020_v0 }
 0x155   :  { %793 = vmatpush3.bf16.msra.mxu1 %v838_v35 }
 0x156   :  { %794 = vmatprep.subr.bf16.mxu1 %v1020_v0 }
 0x159   :  { %795 = vmatpush3.bf16.msra.mxu1 %v839_v45 }
 0x15a   :  { %796 = vmatprep.subr.bf16.mxu1 %v1020_v0  ;;  %v539_v0 = vand.u32 127, %v538_v63 }
 0x15d   :  { %797 = vmatpush3.bf16.msra.mxu1 %v840_v46 }
 0x213   :  { %v287_v37 = vpop.f32.mrb[0].mxu1 }
 0x214   :  { %v760_v38 = vpop.f32.mrb[1].mxu1  ;;  %v288_v40 = vadd.f32 %v677_v36, %v287_v37 }
 0x215   :  { %v290_v39 = vpop.f32.mrb[2].mxu1 }
 0x216   :  { %v291_v41 = vadd.f32 %v677_v36, %v290_v39  ;;  %v761_v42 = vpop.f32.mrb[3].mxu1 }
 0x218   :  { %v294_v43 = vpack.c.bf16 %v291_v41, %v288_v40 }
 0x21a   :  { %v295_v44 = vmax.bf16 %v1022_v26, %v294_v43 }
 0x21c   :  { %779 = vmatmul.mubr.bf16.vlgmr.msra.gmra.mrb[4].mxu0 %v295_v44 }
 0x2ef   :  { %v401_v48 = vpop.f32.mrb[4].mxu0 }
 0x2f0   :  { %v780_v49 = vpop.f32.mrb[5].mxu0  ;;  %v402_v51 = vadd.f32 %v686_v47, %v401_v48 }
 0x2f1   :  { %v404_v50 = vpop.f32.mrb[6].mxu0 }
 0x2f2   :  { %v405_v52 = vadd.f32 %v686_v47, %v404_v50  ;;  %v781_v53 = vpop.f32.mrb[7].mxu0 }
 0x2f4   :  { %v408_v54 = vpack.c.bf16 %v405_v52, %v402_v51 }
 0x2f6   :  { %v409_v55 = vmax.bf16 %v1022_v26, %v408_v54 }
 0x2f8   :  { %799 = vmatmul.mubr.bf16.vlgmr.msra.gmra.mrb[4].mxu1 %v409_v55 }
 0x3cb   :  { %v515_v57 = vpop.f32.mrb[4].mxu1 }
 0x3cc   :  { %v516_v58 = vadd.f32 %v695_v56, %v515_v57  ;;  %v800_v59 = vpop.f32.mrb[5].mxu1 }
 0x3cd   :  { %v518_v60 = vpop.f32.mrb[6].mxu1 }
 0x3ce   :  { %522 = vmax.xlane.f32.xlu0 %v516_v58  ;;  %v801_v61 = vpop.f32.mrb[7].mxu1  ;;  %v519_v62 = vadd.f32 %v695_v56, %v518_v60 }
 0x3d2   :  { %524 = vmax.xlane.f32.xlu0 %v519_v62 }
 0x45b   :  { %v523_v1 = vpop.xlane.xlu0 %522 }
 0x45c   :  { %v526_v2 = vsub.f32 %v516_v58, %v523_v1  ;;  %vm540_vm2 = vcmp.ge.f32.partialorder %v516_v58, %v523_v1 }
 0x45d   :  { %v542_v3 = vsel %vm540_vm2, %v539_v0, 128 }
 0x45e   :  { %v528_v4 = vmul.f32 1.442695, %v526_v2  ;;  %v545_v5 = vshra.s32 %v542_v3, 16  ;;  %v544_v15 = vand.u32 65535, %v542_v3 }
 0x45f   :  { %v525_v6 = vpop.xlane.xlu0 %524 }
 0x460   :  { %841 = vpow2.f32 %v528_v4  ;;  %v527_v7 = vsub.f32 %v519_v62, %v525_v6  ;;  %vm541_vm3 = vcmp.ge.f32.partialorder %v519_v62, %v525_v6  ;;  %v547_v8 = vcvt.s32.f32 %v545_v5 }
 0x461   :  { %v543_v9 = vsel %vm541_vm3, %v539_v0, 128  ;;  %v546_v17 = vcvt.s32.f32 %v544_v15 }
 0x462   :  { %v530_v10 = vmul.f32 1.442695, %v527_v7  ;;  %548 = vmin.xlane.f32.xlu1 %v547_v8  ;;  %v559_v11 = vshra.s32 %v543_v9, 16  ;;  %v558_v18 = vand.u32 65535, %v543_v9 }
 0x464   :  { %843 = vpow2.f32 %v530_v10  ;;  %v561_v12 = vcvt.s32.f32 %v559_v11  ;;  %v560_v21 = vcvt.s32.f32 %v558_v18 }
 0x466   :  { %562 = vmin.xlane.f32.xlu1 %v561_v12 }
 0x46a   :  { %v842_v13 = vpop.eup %841 }
 0x46b   :  { %532 = vadd.xlane.f32.xlu0 %v842_v13 }
 0x46e   :  { %v844_v14 = vpop.eup %843 }
 0x46f   :  { %534 = vadd.xlane.f32.xlu1 %v844_v14 }
 0x4ef   :  { %v549_v16 = vpop.xlane.xlu1 %548 }
 0x4f0   :  { %vm550_vm4 = vcmp.eq.f32.partialorder %v547_v8, %v549_v16  ;;  %v555_v29 = vcvt.f32.s32 %v549_v16 }
 0x4f1   :  { %v551_v19 = vsel %vm550_vm4, %v546_v17, inf }
 0x4f2   :  { %552 = vmin.xlane.f32.xlu0 %v551_v19  ;;  %v556_v31 = vshll.u32 %v555_v29, 16 }
 0x4f3   :  { %v563_v20 = vpop.xlane.xlu1 %562 }
 0x4f4   :  { %vm564_vm5 = vcmp.eq.f32.partialorder %v561_v12, %v563_v20  ;;  %v569_v32 = vcvt.f32.s32 %v563_v20 }
 0x4f5   :  { %v565_v22 = vsel %vm564_vm5, %v560_v21, inf }
 0x4f6   :  { %566 = vmin.xlane.f32.xlu1 %v565_v22  ;;  %v570_v36 = vshll.u32 %v569_v32, 16 }
 0x4f8   :  { %v533_v23 = vpop.xlane.xlu0 %532 }
 0x4f9   :  { %845 = vrcp.f32 %v533_v23 }
 0x4fc   :  { %v535_v24 = vpop.xlane.xlu1 %534 }
 0x4fd   :  { %847 = vrcp.f32 %v535_v24 }
 0x503   :  { %v846_v25 = vpop.eup %845 }
 0x504   :  { %v606_v26 = vsub.f32 1.0, %v846_v25 }
 0x507   :  { %v848_v27 = vpop.eup %847 }
 0x508   :  { %v607_v28 = vsub.f32 1.0, %v848_v27 }
 0x529   :  { %608 = vxpose.xlu1.b32.start [1/2] (short) (narrow) %v606_v26, 8 }
 0x52d   :  { %609 = vxpose.xlu1.b32.end [2/2] (short) (narrow) %v607_v28, 8 }
 0x57f   :  { %v553_v30 = vpop.xlane.xlu0 %552 }
 0x580   :  { %v554_v33 = vcvt.f32.s32 %v553_v30 }
 0x582   :  { %v557_v34 = vadd.s32 %v556_v31, %v554_v33 }
 0x583   :  { %v567_v35 = vpop.xlane.xlu1 %566 }
 0x584   :  { %v568_v37 = vcvt.f32.s32 %v567_v35  ;;  %572 = vxpose.xlu0.b32.start [1/2] (short) (narrow) %v557_v34, 8 }
 0x586   :  { %v571_v38 = vadd.s32 %v570_v36, %v568_v37 }
 0x588   :  { %573 = vxpose.xlu0.b32.end [2/2] (short) (narrow) %v571_v38, 8 }
 0x5a9   :  { %v624_v39 = vpop.trf.xlu1 }
 0x5aa   :  { %640 = vst.msk [vmem:[#allocation12] sm:$0x1] %vm604_vm6, %v624_v39 }
 0x5ab   :  { %970 = shalt.err (!%p967_p2)
}
 0x5ac   :  { %s971_s21 = scalar_lea.hbm %s1251_s10, 16 }
 0x5ad   :  { %p972_p3 = scmp.ne.s32.totalorder %s1251_s10, %s971_s21  ;;  %p975_p4 = scmp.lt.u32.totalorder %s971_s21, %s1251_s10 }
 0x5af   :  { %p977_p5 = pnand %p975_p4, %p972_p3 }
 0x5b1   :  { %980 = shalt.err (!%p977_p5)
}
 0x5b2   :  { %660 = dma.vmem_to_hbm [thread:$0]  %s658_s8, 16, %s1251_s10, [#allocation13]  }
 0x5b3   :  { %s1024_s29 = smov [#allocation11]  }
 0x5b4   :  { %s647_s30 = sshll.u32 %s1024_s29, 4  ;;  %s648_s30 = int_to_ptr.vmem [resolvable:$true] %s647_s30 }
 0x5b5   :  { %s981_s11 = scalar_lea.vmem %s648_s30, 16  ;;  %s985_s5 = scalar_lea.vmem %s648_s30, 32 }
 0x5b6   :  { %p982_p6 = scmp.ne.s32.totalorder %s648_s30, %s981_s11  ;;  %p986_p7 = scmp.lt.s32.totalorder %s648_s30, %s648_s30 }
 0x5b7   :  { %p987_p8 = scmp.lt.s32.totalorder %s985_s5, %s981_s11 }
 0x5b9   :  { %p988_p9 = por %p987_p8, %p986_p7 }
 0x5bb   :  { %p989_p10 = pnand %p988_p9, %p982_p6 }
 0x604   :  { %v588_v40 = vpop.trf.xlu0 }
 0x605   :  { %605 = vst.msk [vmem:[#allocation11] sm:$0x1] %vm604_vm6, %v588_v40 }
 0x606   :  { %992 = shalt.err (!%p989_p10)
}
 0x607   :  { %s993_s3 = scalar_lea.hbm %s1250_s9, 16 }
 0x608   :  { %p994_p11 = scmp.ne.s32.totalorder %s1250_s9, %s993_s3  ;;  %p997_p12 = scmp.lt.u32.totalorder %s993_s3, %s1250_s9 }
 0x60a   :  { %p999_p13 = pnand %p997_p12, %p994_p11 }
 0x60c   :  { %1002 = shalt.err (!%p999_p13)
}
 0x60d   :  { %650 = dma.vmem_to_hbm [thread:$0]  %s648_s30, 16, %s1250_s9, [#allocation4]  }
 0x60e   :  { %1009 = dma.done.wait [#allocation4], 16  }
 0x60f   :  { %1010 = vsyncadd [#allocation4], 4294967280 }
 0x610   :  { %1011 = dma.done.wait [#allocation13], 16  }
 0x611   :  { %1012 = vsyncadd [#allocation13], 4294967280 }
 0x612   :  { %667 = vsyncpa [#allocation3], 1 }
 0x613   :  { %668 = vsyncpa [#allocation6], 1 }
 0x614   :  { %669 = vsyncpa [#allocation9], 1 }
 0x615   :  { %670 = vsyncpa [#allocation4], 1 }
 0x616   :  { %671 = vsyncpa [#allocation13], 1 }

</bundles_post_ra>
